<compile_context>
chip_gen: v7x
topology: tpu7x:2x2x1
jax: 0.10.0
libtpu: 0.0.40
codegen_flags: <defaults>
</compile_context>

<pallas_src>
import functools
import math

import jax
import jax.numpy as jnp
import numpy as np
from jax.experimental import pallas as pl
from jax.experimental.pallas import tpu as pltpu

LN10 = math.log(10.0)


def _round_up(x: int, m: int) -> int:
    return (x + m - 1) // m * m


@functools.lru_cache(maxsize=None)
def _make_filter_constants(n_mags: int, block_size: int, dtype_name: str = "float32"):
    """Host-side (numpy, cached) construction of the linear operators that realize
    amp_to_impulse_response + fft_convolve as three fused matmuls.

    amp -> ir:  ir = irfft(amp); roll(L//2); * hann(L); pad to S; roll(-L//2)   => W [M, S]
    fft_convolve(signal, ir) == causal linear convolution truncated to S samples,
    computed with real-DFT matrices of circular length N = 2S (K = S+1 bins).
    Real/imag halves are zero-padded to Kp = ceil(K/128)*128 lanes and concatenated
    so each half starts on a vreg lane boundary.
    """
    M, S = n_mags, block_size
    L = 2 * (M - 1)
    assert L <= S, "filter impulse response must fit inside one frame"
    K = S + 1
    Kp = _round_up(K, 128)
    N = 2 * S

    # --- amp -> windowed, padded impulse response, as a matrix W [M, S] ----------
    eye = np.eye(M, dtype=np.float64)
    h = np.fft.irfft(eye, axis=-1)                                   # [M, L]
    h = np.roll(h, L // 2, axis=-1)
    hann = 0.5 * (1.0 - np.cos(2.0 * np.pi * np.arange(L) / L))      # periodic hann
    h = h * hann
    h = np.pad(h, ((0, 0), (0, S - L)))
    W = np.roll(h, -(L // 2), axis=-1)                               # [M, S]

    # --- real DFT matrices (circular length N = 2S, K = S+1 bins) ----------------
    k = np.arange(K, dtype=np.float64)
    n_idx = np.arange(S, dtype=np.float64)
    ang = 2.0 * np.pi * n_idx[:, None] * k[None, :] / N
    C = np.cos(ang)                                                  # [S, K]  Re(rfft)
    NS = -np.sin(ang)                                                # [S, K]  Im(rfft)
    wk = np.where((np.arange(K) == 0) | (np.arange(K) == S), 1.0, 2.0)
    ang2 = 2.0 * np.pi * k[:, None] * n_idx[None, :] / N
    ICr = wk[:, None] * np.cos(ang2) / N                             # [K, S]  irfft Re path
    ICi = -wk[:, None] * np.sin(ang2) / N                            # [K, S]  irfft Im path

    # Fold amp->IR into the IR's DFT: rfft(ir) = amp @ WC + i * amp @ WS
    WC = W @ C                                                       # [M, K]
    WS = W @ NS                                                      # [M, K]

    pad_c = lambda x: np.pad(x, ((0, 0), (0, Kp - K)))               # [*, K] -> [*, Kp]
    pad_r = lambda x: np.pad(x, ((0, Kp - K), (0, 0)))               # [K, S] -> [Kp, S]
    dt = np.dtype(dtype_name)
    WCS = np.concatenate([pad_c(WC), pad_c(WS)], axis=1).astype(dt)    # [M, 2Kp]
    CNS = np.concatenate([pad_c(C), pad_c(NS)], axis=1).astype(dt)     # [S, 2Kp]
    IC = np.concatenate([pad_r(ICr), pad_r(ICi)], axis=0).astype(dt)   # [2Kp, S]
    return jnp.asarray(WCS), jnp.asarray(CNS), jnp.asarray(IC)


def _noise_filter_kernel(prm_ref, nz_ref, wcs_ref, cns_ref, ic_ref, out_ref):
    """One tile of TR rows:
    scale_function -> IR spectrum (1 dot) -> noise spectrum (1 dot)
    -> complex multiply -> inverse DFT restricted to the causal window (1 dot)."""
    kp = wcs_ref.shape[-1] // 2
    cdt = wcs_ref.dtype

    # scale_function: 2 * sigmoid(x)**ln(10) + 1e-7, via log-sigmoid = -softplus(-x)
    x = prm_ref[...].astype(jnp.float32)
    amp = 2.0 * jnp.exp(-LN10 * jax.nn.softplus(-x)) + 1e-7           # [TR, M]

    # rfft of the windowed/padded impulse response, fused [re | im] halves: [TR, 2Kp]
    b = jnp.dot(amp.astype(cdt), wcs_ref[...], preferred_element_type=jnp.float32)
    # rfft of the noise frame: [TR, 2Kp]
    a = jnp.dot(nz_ref[...].astype(cdt), cns_ref[...], preferred_element_type=jnp.float32)

    a_re, a_im = a[:, :kp], a[:, kp:]
    b_re, b_im = b[:, :kp], b[:, kp:]
    p = jnp.concatenate([a_re * b_re - a_im * b_im,
                         a_re * b_im + a_im * b_re], axis=-1)         # [TR, 2Kp]

    out = jnp.dot(p.astype(cdt), ic_ref[...], preferred_element_type=jnp.float32)
    out_ref[...] = out.astype(out_ref.dtype)                          # [TR, S]


def filter_noise(noise, noise_param, *, compute_dtype=jnp.float32):
    """scale_function(noise_param) followed by frequency_filter(noise, ...), in Pallas.

    noise       : [B, F, S]
    noise_param : [B, F, M]
    returns     : [B, F, S] in noise_param.dtype
    """
    B, F, S = noise.shape
    assert noise_param.shape[:2] == (B, F)
    M = noise_param.shape[-1]
    out_dtype = noise_param.dtype
    R = B * F

    WCS, CNS, IC = _make_filter_constants(M, S, np.dtype(compute_dtype).name)
    Kp2 = WCS.shape[-1]                                   # = 2 * Kp (multiple of 256)

    nz2 = noise.reshape(R, S)
    prm2 = noise_param.reshape(R, M)                      # native dtype at the HBM boundary

    # Row tile: as large as a conservative VMEM budget allows (cap 256 rows).
    TR = min(256, _round_up(R, 8))
    const_bytes = (WCS.size + CNS.size + IC.size) * WCS.dtype.itemsize * 2   # dbl-buffered
    bytes_per_row = 2 * (M * prm2.dtype.itemsize
                         + S * nz2.dtype.itemsize
                         + S * np.dtype(out_dtype).itemsize)
    budget = 40 * 1024 * 1024                             # fits v7x's 64 MiB VMEM too
    while TR > 8 and const_bytes + TR * bytes_per_row > budget:
        TR = max(8, _round_up(TR // 2, 8))

    # Pad the ragged tail instead of shrinking the tile.
    Rp = _round_up(R, TR)
    if Rp != R:
        nz2 = jnp.pad(nz2, ((0, Rp - R), (0, 0)))
        prm2 = jnp.pad(prm2, ((0, Rp - R), (0, 0)))

    # NOTE: the three constant matrices are grid-invariant; pipeline_mode=pl.Buffered(1)
    # would halve their VMEM footprint if VMEM ever becomes the limiter.
    const_spec = lambda shape: pl.BlockSpec(shape, lambda i: (0, 0))

    out = pl.pallas_call(
        _noise_filter_kernel,
        out_shape=jax.ShapeDtypeStruct((Rp, S), out_dtype),
        grid=(Rp // TR,),
        in_specs=[
            pl.BlockSpec((TR, M), lambda i: (i, 0)),      # noise_param rows
            pl.BlockSpec((TR, S), lambda i: (i, 0)),      # noise rows
            const_spec((M, Kp2)),                         # fused [WC | WS]
            const_spec((S, Kp2)),                         # fused [C  | -sin]
            const_spec((Kp2, S)),                         # fused [ICr ; ICi]
        ],
        out_specs=pl.BlockSpec((TR, S), lambda i: (i, 0)),
        compiler_params=pltpu.CompilerParams(
            dimension_semantics=("parallel",),            # row tiles are independent
            vmem_limit_bytes=48 * 1024 * 1024,
        ),
    )(prm2, nz2, WCS, CNS, IC)

    return out[:R].reshape(B, F, S)


def noise_forward(harmonic, noise_param, key=None, *, compute_dtype=jnp.float32):
    """Pallas equivalent of Noise.forward(harmonic, noise_param)."""
    if key is None:
        key = jax.random.PRNGKey(0)
    # torch.rand_like(harmonic).to(noise_param) * 2 - 1  (same distribution, not bitwise)
    noise = jax.random.uniform(key, harmonic.shape, dtype=noise_param.dtype,
                               minval=-1.0, maxval=1.0)
    return filter_noise(noise, noise_param, compute_dtype=compute_dtype)


def _reference_forward(noise, noise_param):
    """Pure-jnp reference: scale_function + amp_to_impulse_response + fft_convolve."""
    amp = 2.0 * jax.nn.sigmoid(noise_param.astype(jnp.float32)) ** LN10 + 1e-7
    S = noise.shape[-1]
    M = amp.shape[-1]
    L = 2 * (M - 1)
    ir = jnp.fft.irfft(amp, axis=-1)                                  # [B, F, L]
    win = 0.5 * (1.0 - jnp.cos(2.0 * jnp.pi * jnp.arange(L) / L))
    ir = jnp.roll(ir, L // 2, axis=-1) * win
    ir = jnp.pad(ir, ((0, 0), (0, 0), (0, S - L)))
    ir = jnp.roll(ir, -(L // 2), axis=-1)
    sig = jnp.pad(noise.astype(jnp.float32), ((0, 0), (0, 0), (0, S)))
    ker = jnp.pad(ir, ((0, 0), (0, 0), (S, 0)))
    out = jnp.fft.irfft(jnp.fft.rfft(sig) * jnp.fft.rfft(ker), axis=-1)
    return out[..., S:]


if __name__ == "__main__":
    key = jax.random.PRNGKey(0)
    k1, k2, k3 = jax.random.split(key, 3)

    B, F, S, M = 2, 8, 64, 33   # batch, frames, block_size samples, magnitude bands
    harmonic = jax.random.normal(k1, (B, F, S), dtype=jnp.float32)
    noise_param = jax.random.normal(k2, (B, F, M), dtype=jnp.float32)

    # Full module forward (noise drawn internally, like torch.rand_like).
    out = jax.block_until_ready(noise_forward(harmonic, noise_param, key=k3))
    assert out.shape == harmonic.shape, out.shape
    assert out.dtype == noise_param.dtype
    assert bool(jnp.all(jnp.isfinite(out)))

    # Correctness of the filtering path against a jnp.fft reference on identical noise.
    noise = jax.random.uniform(k3, (B, F, S), dtype=jnp.float32, minval=-1.0, maxval=1.0)
    got = jax.block_until_ready(filter_noise(noise, noise_param))
    ref = jax.block_until_ready(_reference_forward(noise, noise_param))
    err = float(jnp.max(jnp.abs(got.astype(jnp.float32) - ref)))
    scale = float(jnp.max(jnp.abs(ref))) + 1e-6
    assert err <= 2e-2 * scale + 1e-4, (err, scale)

    print("KERNEL_OK")
</pallas_src>

<mosaic_0001>
module attributes {stable_mosaic.version = 11 : i64} {
  func.func @_noise_filter_kernel(%arg0: i32, %arg1: memref<16x33xf32, #tpu.memory_space<vmem>>, %arg2: memref<16x64xf32, #tpu.memory_space<vmem>>, %arg3: memref<33x256xf32, #tpu.memory_space<vmem>>, %arg4: memref<64x256xf32, #tpu.memory_space<vmem>>, %arg5: memref<256x64xf32, #tpu.memory_space<vmem>>, %arg6: memref<16x64xf32, #tpu.memory_space<vmem>>) attributes {dimension_semantics = [#tpu.dimension_semantics<parallel>], iteration_bounds = array<i64: 1>, scalar_prefetch = 0 : i64, scratch_operands = 0 : i64, tpu.core_type = #tpu.core_type<tc>, window_params = [{transform_indices = @transform_0, window_bounds = array<i64: 16, 33>}, {transform_indices = @transform_1, window_bounds = array<i64: 16, 64>}, {pipeline_mode = #tpu.pipeline_mode<synchronous>, transform_indices = @transform_2, window_bounds = array<i64: 33, 256>}, {pipeline_mode = #tpu.pipeline_mode<synchronous>, transform_indices = @transform_3, window_bounds = array<i64: 64, 256>}, {pipeline_mode = #tpu.pipeline_mode<synchronous>, transform_indices = @transform_4, window_bounds = array<i64: 256, 64>}, {transform_indices = @transform_5, window_bounds = array<i64: 16, 64>}]} {
    %c0 = arith.constant 0 : index
    %c0_0 = arith.constant 0 : index
    %0 = vector.load %arg1[%c0, %c0_0] : memref<16x33xf32, #tpu.memory_space<vmem>>, vector<16x33xf32>
    %cst = arith.constant 0.000000e+00 : f32
    %1 = vector.broadcast %cst : f32 to vector<16x33xf32>
    %2 = arith.subf %1, %0 : vector<16x33xf32>
    %cst_1 = arith.constant 0.000000e+00 : f32
    %3 = vector.broadcast %cst_1 : f32 to vector<16x33xf32>
    %4 = arith.maximumf %2, %3 : vector<16x33xf32>
    %5 = vector.broadcast %cst_1 : f32 to vector<16x33xf32>
    %6 = arith.subf %2, %5 : vector<16x33xf32>
    %7 = arith.cmpf one, %6, %6 : vector<16x33xf32>
    %8 = vector.broadcast %cst_1 : f32 to vector<16x33xf32>
    %9 = arith.addf %2, %8 : vector<16x33xf32>
    %10 = math.absf %6 : vector<16x33xf32>
    %cst_2 = arith.constant 0.000000e+00 : f32
    %11 = vector.broadcast %cst_2 : f32 to vector<16x33xf32>
    %12 = arith.subf %11, %10 : vector<16x33xf32>
    %13 = math.exp %12 : vector<16x33xf32>
    %14 = math.log1p %13 : vector<16x33xf32>
    %15 = arith.addf %4, %14 : vector<16x33xf32>
    %16 = arith.select %7, %9, %15 : vector<16x33xi1>, vector<16x33xf32>
    %cst_3 = arith.constant -2.30258512 : f32
    %17 = vector.broadcast %cst_3 : f32 to vector<16x33xf32>
    %18 = arith.mulf %17, %16 : vector<16x33xf32>
    %19 = math.exp %18 : vector<16x33xf32>
    %cst_4 = arith.constant 2.000000e+00 : f32
    %20 = vector.broadcast %cst_4 : f32 to vector<16x33xf32>
    %21 = arith.mulf %20, %19 : vector<16x33xf32>
    %cst_5 = arith.constant 1.000000e-07 : f32
    %22 = vector.broadcast %cst_5 : f32 to vector<16x33xf32>
    %23 = arith.addf %21, %22 : vector<16x33xf32>
    %c0_6 = arith.constant 0 : index
    %c0_7 = arith.constant 0 : index
    %24 = vector.load %arg3[%c0_6, %c0_7] : memref<33x256xf32, #tpu.memory_space<vmem>>, vector<33x256xf32>
    %cst_8 = arith.constant dense<0.000000e+00> : vector<16x256xf32>
    %25 = tpu.matmul %23, %24, %cst_8 {dimension_numbers = #tpu.dot_dimension_numbers<[1], [0], [0], [1], [0, 0, 1, 1], [], []>} : vector<16x33xf32>, vector<33x256xf32>, vector<16x256xf32> -> vector<16x256xf32>
    %c0_9 = arith.constant 0 : index
    %c0_10 = arith.constant 0 : index
    %26 = vector.load %arg2[%c0_9, %c0_10] : memref<16x64xf32, #tpu.memory_space<vmem>>, vector<16x64xf32>
    %c0_11 = arith.constant 0 : index
    %c0_12 = arith.constant 0 : index
    %27 = vector.load %arg4[%c0_11, %c0_12] : memref<64x256xf32, #tpu.memory_space<vmem>>, vector<64x256xf32>
    %cst_13 = arith.constant dense<0.000000e+00> : vector<16x256xf32>
    %28 = tpu.matmul %26, %27, %cst_13 {dimension_numbers = #tpu.dot_dimension_numbers<[1], [0], [0], [1], [0, 0, 1, 1], [], []>} : vector<16x64xf32>, vector<64x256xf32>, vector<16x256xf32> -> vector<16x256xf32>
    %29 = vector.extract_strided_slice %28 {offsets = [0, 0], sizes = [16, 128], strides = [1, 1]} : vector<16x256xf32> to vector<16x128xf32>
    %30 = vector.extract_strided_slice %28 {offsets = [0, 128], sizes = [16, 128], strides = [1, 1]} : vector<16x256xf32> to vector<16x128xf32>
    %31 = vector.extract_strided_slice %25 {offsets = [0, 0], sizes = [16, 128], strides = [1, 1]} : vector<16x256xf32> to vector<16x128xf32>
    %32 = vector.extract_strided_slice %25 {offsets = [0, 128], sizes = [16, 128], strides = [1, 1]} : vector<16x256xf32> to vector<16x128xf32>
    %33 = arith.mulf %29, %31 : vector<16x128xf32>
    %34 = arith.mulf %30, %32 : vector<16x128xf32>
    %35 = arith.subf %33, %34 : vector<16x128xf32>
    %36 = arith.mulf %29, %32 : vector<16x128xf32>
    %37 = arith.mulf %30, %31 : vector<16x128xf32>
    %38 = arith.addf %36, %37 : vector<16x128xf32>
    %39 = tpu.concatenate %35, %38 in 1 : vector<16x128xf32>, vector<16x128xf32> -> vector<16x256xf32>
    %c0_14 = arith.constant 0 : index
    %c0_15 = arith.constant 0 : index
    %40 = vector.load %arg5[%c0_14, %c0_15] : memref<256x64xf32, #tpu.memory_space<vmem>>, vector<256x64xf32>
    %cst_16 = arith.constant dense<0.000000e+00> : vector<16x64xf32>
    %41 = tpu.matmul %39, %40, %cst_16 {dimension_numbers = #tpu.dot_dimension_numbers<[1], [0], [0], [1], [0, 0, 1, 1], [], []>} : vector<16x256xf32>, vector<256x64xf32>, vector<16x64xf32> -> vector<16x64xf32>
    %c0_17 = arith.constant 0 : index
    %c0_18 = arith.constant 0 : index
    %42 = vector.load %arg6[%c0_17, %c0_18] : memref<16x64xf32, #tpu.memory_space<vmem>>, vector<16x64xf32>
    tpu.vector_store %arg6[%c0_17, %c0_18], %41 {strides = array<i32>} : memref<16x64xf32, #tpu.memory_space<vmem>>, vector<16x64xf32>,
    return
  }
  func.func @transform_0(%arg0: i32) -> (i32, i32) {
    %c0_i32 = arith.constant 0 : i32
    %c0_i32_0 = arith.constant 0 : i32
    return %arg0, %c0_i32 : i32, i32
  }
  func.func @transform_1(%arg0: i32) -> (i32, i32) {
    %c0_i32 = arith.constant 0 : i32
    %c0_i32_0 = arith.constant 0 : i32
    return %arg0, %c0_i32 : i32, i32
  }
  func.func @transform_2(%arg0: i32) -> (i32, i32) {
    %c0_i32 = arith.constant 0 : i32
    %c0_i32_0 = arith.constant 0 : i32
    %c0_i32_1 = arith.constant 0 : i32
    return %c0_i32, %c0_i32_0 : i32, i32
  }
  func.func @transform_3(%arg0: i32) -> (i32, i32) {
    %c0_i32 = arith.constant 0 : i32
    %c0_i32_0 = arith.constant 0 : i32
    %c0_i32_1 = arith.constant 0 : i32
    return %c0_i32, %c0_i32_0 : i32, i32
  }
  func.func @transform_4(%arg0: i32) -> (i32, i32) {
    %c0_i32 = arith.constant 0 : i32
    %c0_i32_0 = arith.constant 0 : i32
    %c0_i32_1 = arith.constant 0 : i32
    return %c0_i32, %c0_i32_0 : i32, i32
  }
  func.func @transform_5(%arg0: i32) -> (i32, i32) {
    %c0_i32 = arith.constant 0 : i32
    %c0_i32_0 = arith.constant 0 : i32
    return %arg0, %c0_i32 : i32, i32
  }
}

</mosaic_0001>

<bundles_post_ra>
// kernel: tpu_custom_call.1
= control target key start
LH: loop header
LB: loop body
LE: loop exit
PB: predicated region body
PF: predicated region fallthrough
CT: control target
= control target key end

     0   :  { %v551_v7 = vmov 0.0   ;;  %vm88_vm0 = vcmask 1040384   ;;  %s809_s0 = inlined_call_operand.vmem [shape: f32[16,33], index: 0, kind: input, shape index: {}]   ;;  %s810_s1 = inlined_call_operand.vmem [shape: f32[16,64], index: 1, kind: input, shape index: {}]   ;;  %s811_s2 = inlined_call_operand.vmem [shape: f32[33,256], index: 2, kind: input, shape index: {}]   ;;  %s812_s3 = inlined_call_operand.vmem [shape: f32[64,256], index: 3, kind: input, shape index: {}]   ;;  %s813_s4 = inlined_call_operand.vmem [shape: f32[256,64], index: 4, kind: input, shape index: {}]   ;;  %s814_s5 = inlined_call_operand.hbm [shape: f32[16,64], index: 5, kind: output, shape index: {}]  }
   0x1   :  { %v72_v0 = vld [vmem:[%s811_s2 + $0x8] sm:$0xff]  ;;  %v74_v1 = vld [vmem:[%s811_s2 + $0x18] sm:$0xff]  ;;  %v71_v2 = vld [vmem:[%s811_s2] sm:$0xff]  ;;  %159 = vmatprep.mubr.f32.mxu1 %v551_v7 }
   0x2   :  { %v455_v3 = vpack.c.bf16 %v74_v1, %v72_v0  ;;  %v73_v4 = vld [vmem:[%s811_s2 + $0x10] sm:$0xff]  ;;  %v76_v5 = vld [vmem:[%s811_s2 + $0x28] sm:$0xff]  ;;  %v78_v6 = vld [vmem:[%s811_s2 + $0x38] sm:$0xff] }
   0x3   :  { %v457_v8 = vpack.c.bf16 %v73_v4, %v71_v2  ;;  %v459_v9 = vpack.c.bf16 %v78_v6, %v76_v5  ;;  %v75_v10 = vld [vmem:[%s811_s2 + $0x20] sm:$0xff]  ;;  %v77_v11 = vld [vmem:[%s811_s2 + $0x30] sm:$0xff]  ;;  %v80_v15 = vld [vmem:[%s811_s2 + $0x48] sm:$0x1] }
   0x4   :  { %456 = vmatprep.subr.bf16.mxu1 %v455_v3  ;;  %v461_v12 = vpack.c.bf16 %v77_v11, %v75_v10  ;;  %v21_v13 = vld [vmem:[%s809_s0] sm:$0xff]  ;;  %v175_v16 = vld [vmem:[%s812_s3 + $0x8] sm:$0xff]  ;;  %v177_v17 = vld [vmem:[%s812_s3 + $0x18] sm:$0xff] }
   0x5   :  { %458 = vmatpush1.bf16.msra.mxu1 %v457_v8  ;;  %v613_v14 = vsub.f32 0.0, %v21_v13  ;;  %v22_v19 = vld [vmem:[%s809_s0 + $0x8] sm:$0xff]  ;;  %v79_v21 = vld [vmem:[%s811_s2 + $0x40] sm:$0x1]  ;;  %v463_v22 = vpack.c.bf16 %v177_v17, %v175_v16  ;;  %v304_v31 = vld [vmem:[%s813_s4 + $0x90] sm:$0xff] }
   0x6   :  { %460 = vmatprep.subr.bf16.mxu1 %v459_v9  ;;  %v628_v20 = vsub.f32 0.0, %v22_v19  ;;  %v302_v25 = vld [vmem:[%s813_s4 + $0x80] sm:$0xff]  ;;  %v303_v26 = vld [vmem:[%s813_s4 + $0x88] sm:$0xff]  ;;  %v305_v32 = vld [vmem:[%s813_s4 + $0x98] sm:$0xff] }
   0x7   :  { %v31_v18 = vand.u32 2147483647, %v613_v14  ;;  %v286_v27 = vld [vmem:[%s813_s4] sm:$0xff]  ;;  %v479_v29 = vpack.c.bf16 %v303_v26, %v302_v25  ;;  %v287_v30 = vld [vmem:[%s813_s4 + $0x8] sm:$0xff]  ;;  %v483_v35 = vpack.c.bf16 %v305_v32, %v304_v31  ;;  %v288_v36 = vld [vmem:[%s813_s4 + $0x10] sm:$0xff] }
   0x8   :  { %v32_v24 = vand.u32 2147483647, %v628_v20  ;;  %v481_v34 = vpack.c.bf16 %v287_v30, %v286_v27  ;;  %v289_v37 = vld [vmem:[%s813_s4 + $0x18] sm:$0xff]  ;;  %v306_v38 = vld [vmem:[%s813_s4 + $0xa0] sm:$0xff]  ;;  %v307_v39 = vld [vmem:[%s813_s4 + $0xa8] sm:$0xff] }
   0x9   :  { %462 = vmatpush1.bf16.msra.mxu1 %v461_v12  ;;  %v33_v23 = vsub.f32 0.0, %v31_v18  ;;  %480 = vmatprep.subr.bf16.mxu0 %v479_v29  ;;  %v485_v41 = vpack.c.bf16 %v289_v37, %v288_v36 }
   0xa   :  { %411 = vmatprep.subr.msk.mxu1 %vm88_vm0, %v80_v15  ;;  %v34_v33 = vsub.f32 0.0, %v32_v24  ;;  %482 = vmatpush3.bf16.msra.mxu0 %v481_v34 }
   0xb   :  { %v35_v28 = vmul.f32 1.442695, %v33_v23 }
   0xc   :  { %v37_v40 = vmul.f32 1.442695, %v34_v33 }
   0xd   :  { %412 = vmatpush1.msk.msra.mxu1 %vm88_vm0, %v79_v21  ;;  %515 = vpow2.f32 %v35_v28 }
   0xe   :  { %464 = vmatprep.subr.bf16.mxu1 %v463_v22 }
   0xf   :  { %10 = vsyncpa [#allocation3], 0  ;;  %484 = vmatprep.subr.bf16.mxu0 %v483_v35  ;;  %v487_v42 = vpack.c.bf16 %v307_v39, %v306_v38  ;;  %v290_v43 = vld [vmem:[%s813_s4 + $0x20] sm:$0xff]  ;;  %v291_v44 = vld [vmem:[%s813_s4 + $0x28] sm:$0xff]  ;;  %517 = vpow2.f32 %v37_v40  ;;  %v25_v58 = vmax.f32 %v613_v14, 0.0  ;;  %vm27_vm2 = vcmp.ne.f32.partialorder %v613_v14, %v613_v14 }
  0x10   :  { %486 = vmatpush3.bf16.msra.mxu0 %v485_v41  ;;  %v489_v45 = vpack.c.bf16 %v291_v44, %v290_v43  ;;  %v26_v63 = vmax.f32 %v628_v20, 0.0  ;;  %vm28_vm4 = vcmp.ne.f32.partialorder %v628_v20, %v628_v20  ;;  %v174_v11 = vld [vmem:[%s812_s3] sm:$0xff]  ;;  %v176_v12 = vld [vmem:[%s812_s3 + $0x10] sm:$0xff]  ;;  %v181_v15 = vld [vmem:[%s812_s3 + $0x38] sm:$0xff]  ;;  %vm81_vm5 = vcmask 269312  }
  0x11   :  { %488 = vmatprep.subr.bf16.mxu0 %v487_v42  ;;  %v465_v17 = vpack.c.bf16 %v176_v12, %v174_v11  ;;  %v178_v21 = vld [vmem:[%s812_s3 + $0x20] sm:$0xff]  ;;  %v180_v22 = vld [vmem:[%s812_s3 + $0x30] sm:$0xff]  ;;  %v183_v23 = vld [vmem:[%s812_s3 + $0x48] sm:$0xff]  ;;  %vm190_vm6 = vcmask 523264  }
  0x12   :  { %v185_v24 = vld [vmem:[%s812_s3 + $0x58] sm:$0xff]  ;;  %v469_v26 = vpack.c.bf16 %v180_v22, %v178_v21  ;;  %v182_v29 = vld [vmem:[%s812_s3 + $0x40] sm:$0xff]  ;;  %v184_v30 = vld [vmem:[%s812_s3 + $0x50] sm:$0xff] }
  0x13   :  { %v471_v28 = vpack.c.bf16 %v185_v24, %v183_v23  ;;  %v187_v31 = vld [vmem:[%s812_s3 + $0x68] sm:$0xff]  ;;  %v189_v32 = vld [vmem:[%s812_s3 + $0x78] sm:$0xff]  ;;  %v473_v33 = vpack.c.bf16 %v184_v30, %v182_v29  ;;  %v186_v35 = vld [vmem:[%s812_s3 + $0x60] sm:$0xff] }
  0x14   :  { %490 = vmatpush3.bf16.msra.mxu0 %v489_v45  ;;  %v475_v34 = vpack.c.bf16 %v189_v32, %v187_v31  ;;  %v188_v36 = vld [vmem:[%s812_s3 + $0x70] sm:$0xff]  ;;  %v172_v38 = vld [vmem:[%s810_s1] sm:$0xff]  ;;  %v173_v39 = vld [vmem:[%s810_s1 + $0x8] sm:$0xff] }
  0x15   :  { %v477_v37 = vpack.c.bf16 %v188_v36, %v186_v35  ;;  %v308_v40 = vld [vmem:[%s813_s4 + $0xb0] sm:$0xff]  ;;  %v309_v41 = vld [vmem:[%s813_s4 + $0xb8] sm:$0xff]  ;;  %v310_v44 = vld [vmem:[%s813_s4 + $0xc0] sm:$0xff] }
  0x16   :  { %v491_v42 = vpack.c.bf16 %v309_v41, %v308_v40  ;;  %v292_v43 = vld [vmem:[%s813_s4 + $0x30] sm:$0xff] }
  0x17   :  { %v516_v46 = vpop.eup %515 }
  0x18   :  { %v39_v47 = vadd.f32 1.0, %v516_v46  ;;  %v42_v49 = vmul.f32 -0.5, %v516_v46  ;;  %v45_v53 = vand.u32 2147483647, %v516_v46  ;;  %492 = vmatprep.subr.bf16.mxu0 %v491_v42 }
  0x19   :  { %v518_v48 = vpop.eup %517 }
  0x1a   :  { %519 = vlog2.f32 %v39_v47  ;;  %v48_v50 = vadd.f32 1.0, %v518_v48  ;;  %v51_v51 = vmul.f32 -0.5, %v518_v48  ;;  %v43_v52 = vadd.f32 1.0, %v42_v49  ;;  %v294_v47 = vld [vmem:[%s813_s4 + $0x40] sm:$0xff] }
  0x1b   :  { %v54_v56 = vand.u32 2147483647, %v518_v48  ;;  %vm46_vm1 = vcmp.lt.f32.partialorder %v45_v53, 0.0004427343 }
  0x1c   :  { %521 = vlog2.f32 %v48_v50  ;;  %v52_v54 = vadd.f32 1.0, %v51_v51  ;;  %v44_v55 = vmul.f32 %v516_v46, %v43_v52  ;;  %v311_v46 = vld [vmem:[%s813_s4 + $0xc8] sm:$0xff]  ;;  %v312_v51 = vld [vmem:[%s813_s4 + $0xd0] sm:$0xff]  ;;  %v313_v52 = vld [vmem:[%s813_s4 + $0xd8] sm:$0xff] }
  0x1d   :  { %vm55_vm3 = vcmp.lt.f32.partialorder %v54_v56, 0.0004427343  ;;  %v495_v49 = vpack.c.bf16 %v311_v46, %v310_v44  ;;  %v499_v53 = vpack.c.bf16 %v313_v52, %v312_v51  ;;  %v314_v56 = vld [vmem:[%s813_s4 + $0xe0] sm:$0xff] }
  0x1e   :  { %v53_v60 = vmul.f32 %v518_v48, %v52_v54  ;;  %v295_v48 = vld [vmem:[%s813_s4 + $0x48] sm:$0xff]  ;;  %v296_v54 = vld [vmem:[%s813_s4 + $0x50] sm:$0xff] }
  0x1f   :  { %v497_v50 = vpack.c.bf16 %v295_v48, %v294_v47 }
  0x24   :  { %v520_v57 = vpop.eup %519 }
  0x25   :  { %v41_v59 = vmul.f32 0.6931472, %v520_v57  ;;  %v315_v57 = vld [vmem:[%s813_s4 + $0xe8] sm:$0xff] }
  0x26   :  { %v522_v61 = vpop.eup %521 }
  0x27   :  { %v47_v62 = vsel %vm46_vm1, %v44_v55, %v41_v59  ;;  %v50_v1 = vmul.f32 0.6931472, %v522_v61  ;;  %v297_v55 = vld [vmem:[%s813_s4 + $0x58] sm:$0xff]  ;;  %v503_v59 = vpack.c.bf16 %v315_v57, %v314_v56  ;;  %v299_v61 = vld [vmem:[%s813_s4 + $0x68] sm:$0xff] }
  0x28   :  { %v57_v0 = vadd.f32 %v47_v62, %v25_v58  ;;  %v501_v58 = vpack.c.bf16 %v297_v55, %v296_v54 }
  0x29   :  { %v56_v3 = vsel %vm55_vm3, %v53_v60, %v50_v1  ;;  %v298_v60 = vld [vmem:[%s813_s4 + $0x60] sm:$0xff] }
  0x2a   :  { %v59_v2 = vsel %vm27_vm2, %v613_v14, %v57_v0  ;;  %v58_v5 = vadd.f32 %v56_v3, %v26_v63  ;;  %v179_v14 = vld [vmem:[%s812_s3 + $0x28] sm:$0xff]  ;;  %v505_v62 = vpack.c.bf16 %v299_v61, %v298_v60  ;;  %v316_v63 = vld [vmem:[%s813_s4 + $0xf0] sm:$0xff]  ;;  %v317_v0 = vld [vmem:[%s813_s4 + $0xf8] sm:$0xff] }
  0x2b   :  { %v61_v4 = vmul.f32 -2.3025851, %v59_v2  ;;  %v507_v1 = vpack.c.bf16 %v317_v0, %v316_v63  ;;  %v300_v2 = vld [vmem:[%s813_s4 + $0x70] sm:$0xff]  ;;  %v301_v3 = vld [vmem:[%s813_s4 + $0x78] sm:$0xff] }
  0x2c   :  { %v60_v8 = vsel %vm28_vm4, %v628_v20, %v58_v5  ;;  %v467_v20 = vpack.c.bf16 %v181_v15, %v179_v14 }
  0x2d   :  { %v63_v6 = vmul.f32 1.442695, %v61_v4  ;;  %v62_v9 = vmul.f32 -2.3025851, %v60_v8  ;;  %v509_v4 = vpack.c.bf16 %v301_v3, %v300_v2 }
  0x2f   :  { %523 = vpow2.f32 %v63_v6  ;;  %v65_v10 = vmul.f32 1.442695, %v62_v9 }
  0x31   :  { %525 = vpow2.f32 %v65_v10 }
  0x39   :  { %v524_v13 = vpop.eup %523 }
  0x3a   :  { %v67_v16 = vmul.f32 2.0, %v524_v13 }
  0x3b   :  { %v526_v18 = vpop.eup %525 }
  0x3c   :  { %v69_v19 = vadd.f32 1e-07, %v67_v16  ;;  %v68_v25 = vmul.f32 2.0, %v526_v18 }
  0x3e   :  { %413 = vmatmul.mubr.msk.f32.vlgmr.msra.gmra.mrb[0].mxu1 %vm81_vm5, %v69_v19  ;;  %v70_v27 = vadd.f32 1e-07, %v68_v25 }
  0x3f   :  { %466 = vmatpush1.bf16.msra.mxu1 %v465_v17  ;;  %165 = vmatprep.mubr.f32.mxu1 %v551_v7 }
  0x40   :  { %468 = vmatprep.subr.bf16.mxu1 %v467_v20 }
  0x42   :  { %414 = vmatmul.mubr.msk.f32.gmra.mrb[2].mxu1 %vm81_vm5, %v70_v27 }
  0x43   :  { %470 = vmatpush1.bf16.msra.mxu1 %v469_v26  ;;  %261 = vmatprep.mubr.f32.mxu1 %v551_v7 }
  0x44   :  { %472 = vmatprep.subr.bf16.mxu1 %v471_v28 }
  0x47   :  { %474 = vmatpush1.bf16.msra.mxu1 %v473_v33 }
  0x48   :  { %476 = vmatprep.subr.bf16.mxu1 %v475_v34 }
  0x4b   :  { %478 = vmatpush1.bf16.msra.mxu1 %v477_v37 }
  0x4e   :  { %415 = vmatmul.mubr.msk.f32.vlgmr.msra.gmra.mrb[4].mxu1 %vm190_vm6, %v172_v38 }
  0x4f   :  { %267 = vmatprep.mubr.f32.mxu1 %v551_v7  ;;  %v293_v7 = vld [vmem:[%s813_s4 + $0x38] sm:$0xff]  ;;  %s552_s4 = smov [#allocation2]  }
  0x50   :  { %v493_v45 = vpack.c.bf16 %v293_v7, %v292_v43  ;;  %s400_s30 = sshll.u32 %s552_s4, 4  ;;  %s401_s30 = int_to_ptr.vmem [resolvable:$true] %s400_s30 }
  0x51   :  { %s527_s6 = scalar_lea.vmem %s401_s30, 256  ;;  %p532_p1 = scmp.lt.s32.totalorder %s401_s30, %s401_s30 }
  0x52   :  { %416 = vmatmul.mubr.msk.f32.gmra.mrb[6].mxu1 %vm190_vm6, %v173_v39  ;;  %494 = vmatpush3.bf16.msra.mxu0 %v493_v45  ;;  %p528_p0 = scmp.ne.s32.totalorder %s401_s30, %s527_s6  ;;  %p533_p2 = scmp.lt.s32.totalorder %s527_s6, %s527_s6 }
  0x53   :  { %496 = vmatprep.subr.bf16.mxu0 %v495_v49 }
  0x54   :  { %p534_p3 = por %p533_p2, %p532_p1 }
  0x56   :  { %498 = vmatpush3.bf16.msra.mxu0 %v497_v50  ;;  %p535_p4 = pnand %p534_p3, %p528_p0 }
  0x57   :  { %500 = vmatprep.subr.bf16.mxu0 %v499_v53 }
  0x5a   :  { %502 = vmatpush3.bf16.msra.mxu0 %v501_v58 }
  0x5b   :  { %504 = vmatprep.subr.bf16.mxu0 %v503_v59 }
  0x5e   :  { %506 = vmatpush3.bf16.msra.mxu0 %v505_v62 }
  0x5f   :  { %508 = vmatprep.subr.bf16.mxu0 %v507_v1 }
  0x62   :  { %510 = vmatpush3.bf16.msra.mxu0 %v509_v4 }
 0x111   :  { %v161_v5 = vpop.f32.mrb[0].mxu1 }
 0x112   :  { %v163_v6 = vpop.f32.mrb[1].mxu1 }
 0x115   :  { %v167_v8 = vpop.f32.mrb[2].mxu1 }
 0x116   :  { %v169_v9 = vpop.f32.mrb[3].mxu1 }
 0x121   :  { %v263_v10 = vpop.f32.mrb[4].mxu1 }
 0x122   :  { %v274_v11 = vmul.f32 %v263_v10, %v161_v5  ;;  %v280_v12 = vmul.f32 %v263_v10, %v163_v6  ;;  %v265_v13 = vpop.f32.mrb[5].mxu1 }
 0x123   :  { %v276_v14 = vmul.f32 %v265_v13, %v163_v6  ;;  %v282_v15 = vmul.f32 %v265_v13, %v161_v5 }
 0x125   :  { %v278_v16 = vsub.f32 %v274_v11, %v276_v14  ;;  %v269_v17 = vpop.f32.mrb[6].mxu1  ;;  %v284_v18 = vadd.f32 %v282_v15, %v280_v12 }
 0x126   :  { %v275_v19 = vmul.f32 %v269_v17, %v167_v8  ;;  %v281_v20 = vmul.f32 %v269_v17, %v169_v9  ;;  %v271_v21 = vpop.f32.mrb[7].mxu1 }
 0x127   :  { %v277_v22 = vmul.f32 %v271_v21, %v169_v9  ;;  %v283_v23 = vmul.f32 %v271_v21, %v167_v8  ;;  %382 = vmatprep.mubr.f32.mxu0 %v284_v18 }
 0x128   :  { %383 = vmatmul.mubr.f32.vlgmr.msra.gmra.mrb[0].mxu0 %v278_v16 }
 0x129   :  { %v279_v24 = vsub.f32 %v275_v19, %v277_v22  ;;  %v285_v25 = vadd.f32 %v283_v23, %v281_v20 }
 0x12b   :  { %387 = vmatprep.mubr.f32.mxu0 %v285_v25 }
 0x12c   :  { %388 = vmatmul.mubr.f32.gmra.mrb[2].mxu0 %v279_v24 }
 0x1fb   :  { %v449_v26 = vpop.f32.mrb[0].mxu0 }
 0x1fc   :  { %v450_v27 = vpop.f32.mrb[1].mxu0 }
 0x1fd   :  { %v451_v28 = vadd.f32 %v450_v27, %v449_v26 }
 0x1ff   :  { %393 = vst.msk [vmem:[#allocation2] sm:$0xff] %vm190_vm6, %v451_v28  ;;  %v452_v29 = vpop.f32.mrb[2].mxu0 }
 0x200   :  { %v453_v30 = vpop.f32.mrb[3].mxu0 }
 0x201   :  { %v454_v31 = vadd.f32 %v453_v30, %v452_v29 }
 0x203   :  { %394 = vst.msk [vmem:[#allocation2 + $0x8] sm:$0xff] %vm190_vm6, %v454_v31 }
 0x204   :  { %538 = shalt.err (!%p535_p4)
}
 0x205   :  { %s539_s9 = scalar_lea.hbm %s814_s5, 256 }
 0x206   :  { %p540_p5 = scmp.ne.s32.totalorder %s814_s5, %s539_s9  ;;  %p543_p6 = scmp.lt.u32.totalorder %s539_s9, %s814_s5 }
 0x208   :  { %p545_p7 = pnand %p543_p6, %p540_p5 }
 0x20a   :  { %548 = shalt.err (!%p545_p7)
}
 0x20b   :  { %s553_s14 = smov 128   ;;  %s554_s15 = smov 8  }
 0x20c   :  { %406 = dma.vmem_to_hbm [thread:$0]  %s401_s30, 256, %s814_s5, [#allocation3], %s553_s14, %s553_s14, %s554_s15  }
 0x20d   :  { %549 = dma.done.wait [#allocation3], 256  }
 0x20e   :  { %550 = vsyncadd [#allocation3], 4294967040 }
 0x20f   :  { %410 = vsyncpa [#allocation3], 1 }

</bundles_post_ra>
